<compile_context>
chip_gen: v5e
topology: v5e:2x2
jax: 0.10.0
libtpu: 0.0.40
codegen_flags: <defaults>
</compile_context>

<pallas_src>
import jax
import jax.numpy as jnp
from jax.experimental import pallas as pl
from jax.experimental.pallas import tpu as pltpu


def _mlp_kernel(x_ref, w1_ref, b1_ref, w2_ref, b2_ref, w3_ref, b3_ref, o_ref):
    # fc1: (TB, IN) @ (IN, 128) -> (TB, 128); bf16 operands, fp32 accumulate.
    h1 = jnp.dot(x_ref[...].astype(jnp.bfloat16), w1_ref[...],
                 preferred_element_type=jnp.float32)
    h1 = jnp.maximum(h1 + b1_ref[...], 0.0)                     # bias + ReLU (VPU)

    # Move the batch onto the lane axis: (TB, 128) -> (128, TB).
    h1t = jnp.transpose(h1).astype(jnp.bfloat16)                # XLU transpose

    # fc2: (64, 128) @ (128, TB) -> (64, TB); bf16 operands, fp32 accumulate.
    h2 = jnp.dot(w2_ref[...], h1t, preferred_element_type=jnp.float32)
    h2 = jnp.maximum(h2 + b2_ref[...], 0.0)                     # bias + ReLU (VPU)

    # fc3 (64 -> 1): VPU multiply + sublane reduction; result is already a
    # lane-dense (1, TB) row.  b3 is read as a scalar from SMEM.
    logits = jnp.sum(h2 * w3_ref[...], axis=0, keepdims=True) + b3_ref[0]
    o_ref[...] = jax.nn.sigmoid(logits)


def _round_up(n, m):
    return (n + m - 1) // m * m


def neural_network_forward(x, params, *, block_b=1024):
    """x: (B, input_size) float32 -> (B, 1) float32 probabilities."""
    w1, b1, w2, b2, w3, b3 = params
    B, in_features = x.shape
    assert w1.shape == (in_features, 128)

    # Batch tile: multiple of 128 (lane-dense output store), capped at block_b.
    tb = min(_round_up(block_b, 128), _round_up(max(B, 1), 128))
    b_pad = _round_up(B, tb)
    if b_pad != B:
        x = jnp.pad(x, ((0, b_pad - B), (0, 0)))
    grid = (b_pad // tb,)

    # bf16 weights for the MXU (fp32 accumulation happens in-kernel).
    w1_bf16 = w1.astype(jnp.bfloat16)
    w2_bf16 = w2.astype(jnp.bfloat16)

    out = pl.pallas_call(
        _mlp_kernel,
        out_shape=jax.ShapeDtypeStruct((1, b_pad), jnp.float32),
        grid=grid,
        in_specs=[
            pl.BlockSpec((tb, in_features), lambda i: (i, 0)),    # x tile (pipelined)
            pl.BlockSpec((in_features, 128), lambda i: (0, 0)),   # w1, VMEM-resident
            pl.BlockSpec((1, 128), lambda i: (0, 0)),             # b1
            pl.BlockSpec((64, 128), lambda i: (0, 0)),            # w2
            pl.BlockSpec((64, 1), lambda i: (0, 0)),              # b2
            pl.BlockSpec((64, 1), lambda i: (0, 0)),              # w3 (column)
            pl.BlockSpec(memory_space=pltpu.MemorySpace.SMEM),    # b3 scalar
        ],
        out_specs=pl.BlockSpec((1, tb), lambda i: (0, i)),
        compiler_params=pltpu.CompilerParams(
            dimension_semantics=("parallel",)),   # v7x: batch tiles across both TCs
    )(x, w1_bf16, b1, w2_bf16, b2, w3, b3)

    return out[0, :B].reshape(B, 1)


def init_params(key, input_size):
    """PyTorch-style nn.Linear init (uniform +/- 1/sqrt(fan_in)) stored in the
    layouts the kernel consumes:
      w1: (in, 128)  b1: (1, 128)
      w2: (64, 128)  b2: (64, 1)   (w2 is PyTorch's native (out, in) layout)
      w3: (64, 1)    b3: (1,)
    """
    def uniform(k, shape, fan_in):
        bound = 1.0 / jnp.sqrt(jnp.float32(fan_in))
        return jax.random.uniform(k, shape, jnp.float32, -bound, bound)

    k = jax.random.split(key, 6)
    w1 = uniform(k[0], (input_size, 128), input_size)
    b1 = uniform(k[1], (1, 128), input_size)
    w2 = uniform(k[2], (64, 128), 128)
    b2 = uniform(k[3], (64, 1), 128)
    w3 = uniform(k[4], (64, 1), 64)
    b3 = uniform(k[5], (1,), 64)
    return (w1, b1, w2, b2, w3, b3)


def _reference(x, params):
    w1, b1, w2, b2, w3, b3 = params
    h1 = jnp.maximum(x @ w1 + b1, 0.0)
    h2 = jnp.maximum(h1 @ w2.T + b2.T, 0.0)
    return jax.nn.sigmoid(h2 @ w3 + b3)


if __name__ == "__main__":
    key = jax.random.PRNGKey(0)
    k_x, k_x2, k_p = jax.random.split(key, 3)

    batch, input_size = 8, 32          # small shapes consistent with fc1(input_size, 128)
    x = jax.random.normal(k_x, (batch, input_size), jnp.float32)
    params = init_params(k_p, input_size)

    out = neural_network_forward(x, params)
    out = jax.block_until_ready(out)
    ref = _reference(x, params)
    assert out.shape == (batch, 1)
    # bf16 MXU inputs with fp32 accumulation -> slightly looser tolerance vs fp32 ref.
    assert jnp.allclose(out, ref, atol=2e-2, rtol=2e-2), float(jnp.max(jnp.abs(out - ref)))

    # Exercise the multi-tile grid + ragged-tail path (2 tiles of 128, B=200).
    batch2 = 200
    x2 = jax.random.normal(k_x2, (batch2, input_size), jnp.float32)
    out2 = jax.block_until_ready(neural_network_forward(x2, params, block_b=128))
    ref2 = _reference(x2, params)
    assert out2.shape == (batch2, 1)
    assert jnp.allclose(out2, ref2, atol=2e-2, rtol=2e-2), float(jnp.max(jnp.abs(out2 - ref2)))

    print("KERNEL_OK")
</pallas_src>

<mosaic_0001>
module attributes {stable_mosaic.version = 11 : i64} {
  func.func @_mlp_kernel(%arg0: i32, %arg1: memref<128x32xf32, #tpu.memory_space<vmem>>, %arg2: memref<32x128xbf16, #tpu.memory_space<vmem>>, %arg3: memref<1x128xf32, #tpu.memory_space<vmem>>, %arg4: memref<64x128xbf16, #tpu.memory_space<vmem>>, %arg5: memref<64x1xf32, #tpu.memory_space<vmem>>, %arg6: memref<64x1xf32, #tpu.memory_space<vmem>>, %arg7: memref<1xf32, #tpu.memory_space<smem>>, %arg8: memref<1x128xf32, #tpu.memory_space<vmem>>) attributes {dimension_semantics = [#tpu.dimension_semantics<parallel>], iteration_bounds = array<i64: 1>, scalar_prefetch = 0 : i64, scratch_operands = 0 : i64, tpu.core_type = #tpu.core_type<tc>, window_params = [{transform_indices = @transform_0, window_bounds = array<i64: 128, 32>}, {pipeline_mode = #tpu.pipeline_mode<synchronous>, transform_indices = @transform_1, window_bounds = array<i64: 32, 128>}, {pipeline_mode = #tpu.pipeline_mode<synchronous>, transform_indices = @transform_2, window_bounds = array<i64: 1, 128>}, {pipeline_mode = #tpu.pipeline_mode<synchronous>, transform_indices = @transform_3, window_bounds = array<i64: 64, 128>}, {pipeline_mode = #tpu.pipeline_mode<synchronous>, transform_indices = @transform_4, window_bounds = array<i64: 64, 1>}, {pipeline_mode = #tpu.pipeline_mode<synchronous>, transform_indices = @transform_5, window_bounds = array<i64: 64, 1>}, {transform_indices = @transform_6, window_bounds = array<i64: 1>}, {transform_indices = @transform_7, window_bounds = array<i64: 1, 128>}]} {
    %c0 = arith.constant 0 : index
    %c0_0 = arith.constant 0 : index
    %0 = vector.load %arg1[%c0, %c0_0] : memref<128x32xf32, #tpu.memory_space<vmem>>, vector<128x32xf32>
    %1 = arith.truncf %0 : vector<128x32xf32> to vector<128x32xbf16>
    %c0_1 = arith.constant 0 : index
    %c0_2 = arith.constant 0 : index
    %2 = vector.load %arg2[%c0_1, %c0_2] : memref<32x128xbf16, #tpu.memory_space<vmem>>, vector<32x128xbf16>
    %cst = arith.constant dense<0.000000e+00> : vector<128x128xf32>
    %3 = tpu.matmul %1, %2, %cst {dimension_numbers = #tpu.dot_dimension_numbers<[1], [0], [0], [1], [0, 0, 1, 1], [], []>} : vector<128x32xbf16>, vector<32x128xbf16>, vector<128x128xf32> -> vector<128x128xf32>
    %c0_3 = arith.constant 0 : index
    %c0_4 = arith.constant 0 : index
    %4 = vector.load %arg3[%c0_3, %c0_4] : memref<1x128xf32, #tpu.memory_space<vmem>>, vector<1x128xf32>
    %5 = vector.broadcast %4 : vector<1x128xf32> to vector<128x128xf32>
    %6 = arith.addf %3, %5 : vector<128x128xf32>
    %cst_5 = arith.constant 0.000000e+00 : f32
    %7 = vector.broadcast %cst_5 : f32 to vector<128x128xf32>
    %8 = arith.maximumf %6, %7 : vector<128x128xf32>
    %9 = tpu.transpose %8, [1, 0] : vector<128x128xf32> -> vector<128x128xf32>
    %10 = arith.truncf %9 : vector<128x128xf32> to vector<128x128xbf16>
    %c0_6 = arith.constant 0 : index
    %c0_7 = arith.constant 0 : index
    %11 = vector.load %arg4[%c0_6, %c0_7] : memref<64x128xbf16, #tpu.memory_space<vmem>>, vector<64x128xbf16>
    %cst_8 = arith.constant dense<0.000000e+00> : vector<64x128xf32>
    %12 = tpu.matmul %11, %10, %cst_8 {dimension_numbers = #tpu.dot_dimension_numbers<[1], [0], [0], [1], [0, 0, 1, 1], [], []>} : vector<64x128xbf16>, vector<128x128xbf16>, vector<64x128xf32> -> vector<64x128xf32>
    %c0_9 = arith.constant 0 : index
    %c0_10 = arith.constant 0 : index
    %13 = vector.load %arg5[%c0_9, %c0_10] : memref<64x1xf32, #tpu.memory_space<vmem>>, vector<64x1xf32>
    %14 = vector.broadcast %13 : vector<64x1xf32> to vector<64x128xf32>
    %15 = arith.addf %12, %14 : vector<64x128xf32>
    %cst_11 = arith.constant 0.000000e+00 : f32
    %16 = vector.broadcast %cst_11 : f32 to vector<64x128xf32>
    %17 = arith.maximumf %15, %16 : vector<64x128xf32>
    %c0_12 = arith.constant 0 : index
    %c0_13 = arith.constant 0 : index
    %18 = vector.load %arg6[%c0_12, %c0_13] : memref<64x1xf32, #tpu.memory_space<vmem>>, vector<64x1xf32>
    %19 = vector.broadcast %18 : vector<64x1xf32> to vector<64x128xf32>
    %20 = arith.mulf %17, %19 : vector<64x128xf32>
    %cst_14 = arith.constant dense<0.000000e+00> : vector<128xf32>
    %21 = vector.multi_reduction <add>, %20, %cst_14 [0] : vector<64x128xf32> to vector<128xf32>
    %22 = vector.shape_cast %21 : vector<128xf32> to vector<1x128xf32>
    %c0_15 = arith.constant 0 : index
    %23 = memref.load %arg7[%c0_15] : memref<1xf32, #tpu.memory_space<smem>>
    %24 = vector.broadcast %23 : f32 to vector<1x128xf32>
    %25 = arith.addf %22, %24 : vector<1x128xf32>
    %26 = arith.negf %25 : vector<1x128xf32>
    %27 = math.exp %26 : vector<1x128xf32>
    %cst_16 = arith.constant 1.000000e+00 : f32
    %28 = vector.broadcast %cst_16 : f32 to vector<1x128xf32>
    %29 = arith.addf %28, %27 : vector<1x128xf32>
    %30 = arith.divf %28, %29 : vector<1x128xf32>
    %c0_17 = arith.constant 0 : index
    %c0_18 = arith.constant 0 : index
    %31 = vector.load %arg8[%c0_17, %c0_18] : memref<1x128xf32, #tpu.memory_space<vmem>>, vector<1x128xf32>
    tpu.vector_store %arg8[%c0_17, %c0_18], %30 {strides = array<i32>} : memref<1x128xf32, #tpu.memory_space<vmem>>, vector<1x128xf32>,
    return
  }
  func.func @transform_0(%arg0: i32) -> (i32, i32) {
    %c0_i32 = arith.constant 0 : i32
    %c0_i32_0 = arith.constant 0 : i32
    return %arg0, %c0_i32 : i32, i32
  }
  func.func @transform_1(%arg0: i32) -> (i32, i32) {
    %c0_i32 = arith.constant 0 : i32
    %c0_i32_0 = arith.constant 0 : i32
    %c0_i32_1 = arith.constant 0 : i32
    return %c0_i32, %c0_i32_0 : i32, i32
  }
  func.func @transform_2(%arg0: i32) -> (i32, i32) {
    %c0_i32 = arith.constant 0 : i32
    %c0_i32_0 = arith.constant 0 : i32
    %c0_i32_1 = arith.constant 0 : i32
    return %c0_i32, %c0_i32_0 : i32, i32
  }
  func.func @transform_3(%arg0: i32) -> (i32, i32) {
    %c0_i32 = arith.constant 0 : i32
    %c0_i32_0 = arith.constant 0 : i32
    %c0_i32_1 = arith.constant 0 : i32
    return %c0_i32, %c0_i32_0 : i32, i32
  }
  func.func @transform_4(%arg0: i32) -> (i32, i32) {
    %c0_i32 = arith.constant 0 : i32
    %c0_i32_0 = arith.constant 0 : i32
    %c0_i32_1 = arith.constant 0 : i32
    return %c0_i32, %c0_i32_0 : i32, i32
  }
  func.func @transform_5(%arg0: i32) -> (i32, i32) {
    %c0_i32 = arith.constant 0 : i32
    %c0_i32_0 = arith.constant 0 : i32
    %c0_i32_1 = arith.constant 0 : i32
    return %c0_i32, %c0_i32_0 : i32, i32
  }
  func.func @transform_6(%arg0: i32) -> i32 {
    %c0_i32 = arith.constant 0 : i32
    %c0_i32_0 = arith.constant 0 : i32
    return %c0_i32 : i32
  }
  func.func @transform_7(%arg0: i32) -> (i32, i32) {
    %c0_i32 = arith.constant 0 : i32
    %c0_i32_0 = arith.constant 0 : i32
    return %c0_i32, %arg0 : i32, i32
  }
}

</mosaic_0001>

<bundles_post_ra>
// kernel: tpu_custom_call.1
= control target key start
LH: loop header
LB: loop body
LE: loop exit
PB: predicated region body
PF: predicated region fallthrough
CT: control target
= control target key end

     0   :  { %s694_s0 = inlined_call_operand.vmem [shape: f32[128,32], index: 0, kind: input, shape index: {}]   ;;  %s695_s1 = inlined_call_operand.vmem [shape: bf16[32,128], index: 1, kind: input, shape index: {}]   ;;  %s696_s2 = inlined_call_operand.vmem [shape: f32[1,128], index: 2, kind: input, shape index: {}]   ;;  %s697_s3 = inlined_call_operand.vmem [shape: bf16[64,128], index: 3, kind: input, shape index: {}]   ;;  %s698_s4 = inlined_call_operand.vmem [shape: f32[64,1], index: 4, kind: input, shape index: {}]   ;;  %s699_s5 = inlined_call_operand.vmem [shape: f32[64,1], index: 5, kind: input, shape index: {}]   ;;  %s700_s6 = inlined_call_operand.<no memory space> [shape: f32[1], index: 6, kind: input, shape index: {}]   ;;  %s701_s7 = inlined_call_operand.hbm [shape: f32[1,128], index: 7, kind: output, shape index: {}]  }
   0x1   :  { %v462_v0 = vld [vmem:[%s695_s1 + $0x8] sm:$0xff]  ;;  %v461_v1 = vld [vmem:[%s695_s1] sm:$0xff] }
   0x2   :  { %104 = vmatpush.bf16.msra.mxu0 %v462_v0  ;;  %v29_v2 = vld [vmem:[%s694_s0] sm:$0xff]  ;;  %v30_v3 = vld [vmem:[%s694_s0 + $0x8] sm:$0xff]  ;;  %467 = vmatpush.bf16.msra.mxu2 %v462_v0 }
   0x3   :  { %13 = vsyncpa [#allocation4], 0  ;;  %v45_v4 = vpack.c.bf16 %v30_v3, %v29_v2  ;;  %vm73_vm0 = vcmask 261120   ;;  %v31_v5 = vld [vmem:[%s694_s0 + $0x10] sm:$0xff]  ;;  %v32_v6 = vld [vmem:[%s694_s0 + $0x18] sm:$0xff]  ;;  %s514_s25 = smov [#allocation3]  }
   0x4   :  { %v46_v7 = vpack.c.bf16 %v32_v6, %v31_v5  ;;  %v37_v8 = vld [vmem:[%s694_s0 + $0x40] sm:$0xff]  ;;  %v38_v9 = vld [vmem:[%s694_s0 + $0x48] sm:$0xff]  ;;  %v39_v13 = vld [vmem:[%s694_s0 + $0x50] sm:$0xff]  ;;  %s417_s26 = sshll.u32 %s514_s25, 4  ;;  %s418_s26 = int_to_ptr.vmem [resolvable:$true] %s417_s26 }
   0x5   :  { %v49_v10 = vpack.c.bf16 %v38_v9, %v37_v8  ;;  %v33_v11 = vld [vmem:[%s694_s0 + $0x20] sm:$0xff]  ;;  %v34_v12 = vld [vmem:[%s694_s0 + $0x28] sm:$0xff]  ;;  %v40_v14 = vld [vmem:[%s694_s0 + $0x58] sm:$0xff] }
   0x6   :  { %105 = vmatpush.bf16.msra.mxu0 %v461_v1  ;;  %468 = vmatpush.bf16.msra.mxu2 %v461_v1  ;;  %v47_v15 = vpack.c.bf16 %v34_v12, %v33_v11  ;;  %v50_v16 = vpack.c.bf16 %v40_v14, %v39_v13  ;;  %v35_v17 = vld [vmem:[%s694_s0 + $0x30] sm:$0xff]  ;;  %v36_v18 = vld [vmem:[%s694_s0 + $0x38] sm:$0xff]  ;;  %v41_v19 = vld [vmem:[%s694_s0 + $0x60] sm:$0xff] }
   0x7   :  { %v42_v20 = vld [vmem:[%s694_s0 + $0x68] sm:$0xff]  ;;  %v48_v21 = vpack.c.bf16 %v36_v18, %v35_v17  ;;  %v43_v23 = vld [vmem:[%s694_s0 + $0x70] sm:$0xff]  ;;  %v44_v24 = vld [vmem:[%s694_s0 + $0x78] sm:$0xff] }
   0x8   :  { %v51_v22 = vpack.c.bf16 %v42_v20, %v41_v19  ;;  %v52_v25 = vpack.c.bf16 %v44_v24, %v43_v23  ;;  %v482_v26 = vld [vmem:[%s696_s2] ss:$0 sm:$0xff] }
   0x9   :  { %436 = vmatmul.msk.bf16.vlgmr.msra.gmra.mxu0 %vm73_vm0, %v45_v4  ;;  %440 = vmatmul.msk.bf16.vlgmr.msra.gmra.mxu2 %vm73_vm0, %v49_v10  ;;  %v211_v24 = vld [vmem:[%s698_s4] sm:$0xff] }
  0x19   :  { %437 = vmatmul.msk.bf16.gmra.mxu0 %vm73_vm0, %v46_v7  ;;  %441 = vmatmul.msk.bf16.gmra.mxu2 %vm73_vm0, %v50_v16 }
  0x29   :  { %438 = vmatmul.msk.bf16.gmra.mxu0 %vm73_vm0, %v47_v15  ;;  %442 = vmatmul.msk.bf16.gmra.mxu2 %vm73_vm0, %v51_v22 }
  0x39   :  { %439 = vmatmul.msk.bf16.gmra.mxu0 %vm73_vm0, %v48_v21  ;;  %443 = vmatmul.msk.bf16.gmra.mxu2 %vm73_vm0, %v52_v25  ;;  %v513_v25 = vmov 0  }
  0x3a   :  { %479 = vset.pattern.permute.xlu1 %v513_v25  ;;  %480 = vset.pattern.permute.xlu2 %v513_v25 }
  0x3b   :  { %221 = vperm.xlu1 %479, %v211_v24  }
  0x86   :  { %v107_v27 = vpop.f32.mrf.mxu0 }
  0x87   :  { %v108_v28 = vadd.f32 %v482_v26, %v107_v27  ;;  %v212_v27 = vld [vmem:[%s698_s4 + $0x8] sm:$0xff] }
  0x88   :  { %226 = vperm.xlu1 %479, %v212_v27  }
  0x89   :  { %v147_v29 = vmax.f32 %v108_v28, 0.0 }
  0x8b   :  { %163 = vxpose.xlu0.b32.start [1/16] %v147_v29, 128  ;;  %v320_v29 = vld [vmem:[%s699_s5] sm:$0xff] }
  0x8c   :  { %v127_v45 = vpop.f32.mrf.mxu2 }
  0x8d   :  { %v128_v53 = vadd.f32 %v482_v26, %v127_v45  ;;  %v323_v45 = vld [vmem:[%s699_s5 + $0x18] sm:$0xff] }
  0x8e   :  { %v109_v30 = vpop.f32.mrf.mxu0 }
  0x8f   :  { %v110_v31 = vadd.f32 %v482_v26, %v109_v30  ;;  %v155_v54 = vmax.f32 %v128_v53, 0.0  ;;  %v464_v53 = vld [vmem:[%s697_s3 + $0x8] sm:$0xff] }
  0x90   :  { %330 = vperm.xlu1 %479, %v320_v29  }
  0x91   :  { %v148_v32 = vmax.f32 %v110_v31, 0.0  ;;  %v215_v31 = vld [vmem:[%s698_s4 + $0x20] sm:$0xff] }
  0x93   :  { %164 = vxpose.xlu0.b32.cont [2/16] %v148_v32, 128  ;;  %v213_v32 = vld [vmem:[%s698_s4 + $0x10] sm:$0xff] }
  0x94   :  { %v129_v50 = vpop.f32.mrf.mxu2  ;;  %231 = vperm.xlu2 %480, %v213_v32  }
  0x95   :  { %v130_v56 = vadd.f32 %v482_v26, %v129_v50  ;;  %v325_v50 = vld [vmem:[%s699_s5 + $0x28] sm:$0xff] }
  0x96   :  { %v112_v33 = vpop.f32.mrf.mxu0 }
  0x97   :  { %v113_v34 = vadd.f32 %v482_v26, %v112_v33  ;;  %v156_v57 = vmax.f32 %v130_v56, 0.0 }
  0x98   :  { %241 = vperm.xlu1 %479, %v215_v31  }
  0x99   :  { %v149_v35 = vmax.f32 %v113_v34, 0.0  ;;  %v216_v34 = vld [vmem:[%s698_s4 + $0x28] sm:$0xff] }
  0x9b   :  { %165 = vxpose.xlu0.b32.cont [3/16] %v149_v35, 128  ;;  %v214_v35 = vld [vmem:[%s698_s4 + $0x18] sm:$0xff] }
  0x9c   :  { %v132_v55 = vpop.f32.mrf.mxu2  ;;  %236 = vperm.xlu2 %480, %v214_v35  }
  0x9d   :  { %v133_v59 = vadd.f32 %v482_v26, %v132_v55  ;;  %v466_v55 = vld [vmem:[%s697_s3 + $0x18] sm:$0xff] }
  0x9e   :  { %v114_v36 = vpop.f32.mrf.mxu0 }
  0x9f   :  { %v115_v37 = vadd.f32 %v482_v26, %v114_v36  ;;  %v157_v60 = vmax.f32 %v133_v59, 0.0 }
  0xa0   :  { %246 = vperm.xlu1 %479, %v216_v34  }
  0xa1   :  { %v150_v38 = vmax.f32 %v115_v37, 0.0  ;;  %v217_v37 = vld [vmem:[%s698_s4 + $0x30] sm:$0xff] }
  0xa3   :  { %166 = vxpose.xlu0.b32.cont [4/16] %v150_v38, 128  ;;  %v321_v38 = vld [vmem:[%s699_s5 + $0x8] sm:$0xff] }
  0xa4   :  { %v134_v58 = vpop.f32.mrf.mxu2  ;;  %335 = vperm.xlu2 %480, %v321_v38  }
  0xa5   :  { %v135_v62 = vadd.f32 %v482_v26, %v134_v58 }
  0xa6   :  { %v117_v39 = vpop.f32.mrf.mxu0 }
  0xa7   :  { %v118_v40 = vadd.f32 %v482_v26, %v117_v39  ;;  %v158_v63 = vmax.f32 %v135_v62, 0.0 }
  0xa8   :  { %251 = vperm.xlu1 %479, %v217_v37  }
  0xa9   :  { %v151_v41 = vmax.f32 %v118_v40, 0.0  ;;  %v218_v40 = vld [vmem:[%s698_s4 + $0x38] sm:$0xff] }
  0xab   :  { %167 = vxpose.xlu0.b32.cont [5/16] %v151_v41, 128  ;;  %v322_v41 = vld [vmem:[%s699_s5 + $0x10] sm:$0xff] }
  0xac   :  { %v137_v61 = vpop.f32.mrf.mxu2  ;;  %340 = vperm.xlu2 %480, %v322_v41  }
  0xad   :  { %v138_v0 = vadd.f32 %v482_v26, %v137_v61  ;;  %v222_v56 = vpop.permute.xlu1 %221 }
  0xae   :  { %v119_v42 = vpop.f32.mrf.mxu0 }
  0xaf   :  { %v120_v43 = vadd.f32 %v482_v26, %v119_v42  ;;  %v159_v2 = vmax.f32 %v138_v0, 0.0 }
  0xb0   :  { %256 = vperm.xlu1 %479, %v218_v40  }
  0xb1   :  { %v152_v44 = vmax.f32 %v120_v43, 0.0 }
  0xb3   :  { %168 = vxpose.xlu0.b32.cont [6/16] %v152_v44, 128  ;;  %v326_v44 = vld [vmem:[%s699_s5 + $0x30] sm:$0xff] }
  0xb4   :  { %v139_v1 = vpop.f32.mrf.mxu2  ;;  %345 = vperm.xlu2 %480, %v323_v45  }
  0xb5   :  { %v140_v3 = vadd.f32 %v482_v26, %v139_v1 }
  0xb6   :  { %v122_v46 = vpop.f32.mrf.mxu0 }
  0xb7   :  { %v123_v47 = vadd.f32 %v482_v26, %v122_v46  ;;  %v160_v5 = vmax.f32 %v140_v3, 0.0 }
  0xb8   :  { %360 = vperm.xlu1 %479, %v326_v44  }
  0xb9   :  { %v153_v48 = vmax.f32 %v123_v47, 0.0 }
  0xbb   :  { %169 = vxpose.xlu0.b32.cont [7/16] %v153_v48, 128  ;;  %v324_v48 = vld [vmem:[%s699_s5 + $0x20] sm:$0xff] }
  0xbc   :  { %v142_v4 = vpop.f32.mrf.mxu2  ;;  %350 = vperm.xlu2 %480, %v324_v48  }
  0xbd   :  { %v143_v6 = vadd.f32 %v482_v26, %v142_v4 }
  0xbe   :  { %v124_v49 = vpop.f32.mrf.mxu0 }
  0xbf   :  { %v125_v51 = vadd.f32 %v482_v26, %v124_v49  ;;  %v161_v7 = vmax.f32 %v143_v6, 0.0 }
  0xc1   :  { %v154_v52 = vmax.f32 %v125_v51, 0.0  ;;  %v327_v51 = vld [vmem:[%s699_s5 + $0x38] sm:$0xff] }
  0xc3   :  { %170 = vxpose.xlu0.b32.cont [8/16] %v154_v52, 128  ;;  %v463_v52 = vld [vmem:[%s697_s3] sm:$0xff] }
  0xc4   :  { %v144_v8 = vpop.f32.mrf.mxu2  ;;  %355 = vperm.xlu2 %480, %v325_v50  }
  0xc5   :  { %v145_v9 = vadd.f32 %v482_v26, %v144_v8 }
  0xc7   :  { %v162_v10 = vmax.f32 %v145_v9, 0.0 }
  0xcb   :  { %171 = vxpose.xlu0.b32.cont [9/16] %v155_v54, 128  ;;  %v465_v54 = vld [vmem:[%s697_s3 + $0x10] sm:$0xff] }
  0xcc   :  { %365 = vperm.xlu2 %480, %v327_v51  }
  0xd3   :  { %172 = vxpose.xlu0.b32.cont [10/16] %v156_v57, 128 }
  0xdb   :  { %173 = vxpose.xlu0.b32.cont [11/16] %v157_v60, 128 }
  0xe3   :  { %174 = vxpose.xlu0.b32.cont [12/16] %v158_v63, 128 }
  0xeb   :  { %175 = vxpose.xlu0.b32.cont [13/16] %v159_v2, 128 }
  0xee   :  { %v232_v57 = vpop.permute.xlu2 %231 }
  0xf3   :  { %176 = vxpose.xlu0.b32.cont [14/16] %v160_v5, 128 }
  0xf6   :  { %v237_v59 = vpop.permute.xlu2 %236 }
  0xfa   :  { %v227_v58 = vpop.permute.xlu1 %226 }
  0xfb   :  { %177 = vxpose.xlu0.b32.cont [15/16] %v161_v7, 128 }
  0xfe   :  { %v336_v61 = vpop.permute.xlu2 %335 }
 0x102   :  { %v331_v60 = vpop.permute.xlu1 %330 }
 0x103   :  { %178 = vxpose.xlu0.b32.end [16/16] %v162_v10, 128 }
 0x106   :  { %v341_v0 = vpop.permute.xlu2 %340 }
 0x10a   :  { %v242_v62 = vpop.permute.xlu1 %241 }
 0x10e   :  { %v346_v4 = vpop.permute.xlu2 %345 }
 0x112   :  { %v247_v3 = vpop.permute.xlu1 %246 }
 0x116   :  { %v351_v10 = vpop.permute.xlu2 %350 }
 0x11a   :  { %v252_v7 = vpop.permute.xlu1 %251 }
 0x11e   :  { %v356_v27 = vpop.permute.xlu2 %355 }
 0x12f   :  { %v179_v11 = vpop.trf.xlu0 }
 0x137   :  { %v180_v12 = vpop.trf.xlu0 }
 0x138   :  { %v620_v13 = vpack.c.bf16 %v180_v12, %v179_v11 }
 0x13f   :  { %v181_v14 = vpop.trf.xlu0 }
 0x147   :  { %v182_v15 = vpop.trf.xlu0 }
 0x148   :  { %v622_v16 = vpack.c.bf16 %v182_v15, %v181_v14 }
 0x14f   :  { %v183_v17 = vpop.trf.xlu0 }
 0x157   :  { %v184_v18 = vpop.trf.xlu0 }
 0x158   :  { %v197_v19 = vpack.c.bf16 %v184_v18, %v183_v17  ;;  %v257_v18 = vpop.permute.xlu1 %256 }
 0x15f   :  { %v185_v20 = vpop.trf.xlu0 }
 0x167   :  { %v186_v21 = vpop.trf.xlu0 }
 0x168   :  { %v198_v22 = vpack.c.bf16 %v186_v21, %v185_v20 }
 0x16a   :  { %481 = vset.pattern.permute.xlu0 %v513_v25 }
 0x16f   :  { %v187_v23 = vpop.trf.xlu0 }
 0x177   :  { %v188_v26 = vpop.trf.xlu0 }
 0x178   :  { %v199_v49 = vpack.c.bf16 %v188_v26, %v187_v23 }
 0x17f   :  { %v189_v28 = vpop.trf.xlu0 }
 0x187   :  { %v190_v30 = vpop.trf.xlu0 }
 0x188   :  { %v200_v47 = vpack.c.bf16 %v190_v30, %v189_v28 }
 0x18f   :  { %v191_v33 = vpop.trf.xlu0 }
 0x197   :  { %v192_v36 = vpop.trf.xlu0 }
 0x198   :  { %v201_v46 = vpack.c.bf16 %v192_v36, %v191_v33  ;;  %v361_v36 = vpop.permute.xlu1 %360 }
 0x19f   :  { %v193_v39 = vpop.trf.xlu0 }
 0x1a7   :  { %v194_v42 = vpop.trf.xlu0 }
 0x1a8   :  { %v202_v43 = vpack.c.bf16 %v194_v42, %v193_v39 }
 0x1aa   :  { %283 = vmatpush.bf16.msra.mxu1 %v202_v43  ;;  %469 = vmatpush.bf16.msra.mxu3 %v202_v43  ;;  %v366_v43 = vpop.permute.xlu2 %365 }
 0x1ae   :  { %284 = vmatpush.bf16.msra.mxu1 %v201_v46  ;;  %470 = vmatpush.bf16.msra.mxu3 %v201_v46 }
 0x1b2   :  { %285 = vmatpush.bf16.msra.mxu1 %v200_v47  ;;  %471 = vmatpush.bf16.msra.mxu3 %v200_v47 }
 0x1b6   :  { %286 = vmatpush.bf16.msra.mxu1 %v199_v49  ;;  %472 = vmatpush.bf16.msra.mxu3 %v199_v49 }
 0x1ba   :  { %287 = vmatpush.bf16.msra.mxu1 %v198_v22  ;;  %473 = vmatpush.bf16.msra.mxu3 %v198_v22 }
 0x1be   :  { %288 = vmatpush.bf16.msra.mxu1 %v197_v19  ;;  %474 = vmatpush.bf16.msra.mxu3 %v197_v19 }
 0x1c2   :  { %289 = vmatpush.bf16.msra.mxu1 %v622_v16  ;;  %475 = vmatpush.bf16.msra.mxu3 %v622_v16 }
 0x1c6   :  { %290 = vmatpush.bf16.msra.mxu1 %v620_v13  ;;  %476 = vmatpush.bf16.msra.mxu3 %v620_v13 }
 0x1c9   :  { %291 = vmatmul.bf16.vlgmr.msra.gmra.mxu1 %v463_v52  ;;  %296 = vmatmul.bf16.vlgmr.msra.gmra.mxu3 %v464_v53  ;;  %v390_v52 = vstv %s700_s6  ;;  %s419_s6 = sshll.u32 %s701_s7, 4  ;;  %s420_s6 = int_to_ptr.hbm [resolvable:$true] %s419_s6 }
 0x1d9   :  { %301 = vmatmul.bf16.gmra.mxu3 %v465_v54 }
 0x1e9   :  { %306 = vmatmul.bf16.gmra.mxu3 %v466_v55 }
 0x246   :  { %v292_v1 = vpop.f32.mrf.mxu1 }
 0x247   :  { %v293_v9 = vadd.f32 %v292_v1, %v222_v56 }
 0x249   :  { %v312_v13 = vmax.f32 %v293_v9, 0.0 }
 0x24b   :  { %v368_v19 = vmul.f32 %v331_v60, %v312_v13 }
 0x24c   :  { %v297_v63 = vpop.f32.mrf.mxu3 }
 0x24d   :  { %v298_v14 = vadd.f32 %v297_v63, %v232_v57 }
 0x24e   :  { %v294_v6 = vpop.f32.mrf.mxu1 }
 0x24f   :  { %v295_v8 = vadd.f32 %v294_v6, %v227_v58  ;;  %v314_v20 = vmax.f32 %v298_v14, 0.0 }
 0x251   :  { %v313_v12 = vmax.f32 %v295_v8, 0.0  ;;  %v370_v28 = vmul.f32 %v341_v0, %v314_v20 }
 0x253   :  { %v369_v16 = vmul.f32 %v336_v61, %v313_v12 }
 0x254   :  { %v299_v2 = vpop.f32.mrf.mxu3 }
 0x255   :  { %v300_v15 = vadd.f32 %v299_v2, %v237_v59  ;;  %v376_v24 = vadd.f32 %v369_v16, %v368_v19 }
 0x257   :  { %v315_v21 = vmax.f32 %v300_v15, 0.0  ;;  %v377_v31 = vadd.f32 %v376_v24, %v370_v28 }
 0x259   :  { %v371_v29 = vmul.f32 %v346_v4, %v315_v21 }
 0x25b   :  { %v378_v34 = vadd.f32 %v377_v31, %v371_v29 }
 0x25c   :  { %v302_v5 = vpop.f32.mrf.mxu3 }
 0x25d   :  { %v303_v17 = vadd.f32 %v302_v5, %v242_v62 }
 0x25f   :  { %v316_v25 = vmax.f32 %v303_v17, 0.0 }
 0x261   :  { %v372_v32 = vmul.f32 %v351_v10, %v316_v25 }
 0x263   :  { %v379_v38 = vadd.f32 %v378_v34, %v372_v32 }
 0x264   :  { %v304_v11 = vpop.f32.mrf.mxu3 }
 0x265   :  { %v305_v22 = vadd.f32 %v304_v11, %v247_v3 }
 0x267   :  { %v317_v30 = vmax.f32 %v305_v22, 0.0 }
 0x269   :  { %v373_v35 = vmul.f32 %v356_v27, %v317_v30 }
 0x26b   :  { %v380_v41 = vadd.f32 %v379_v38, %v373_v35 }
 0x26c   :  { %v307_v23 = vpop.f32.mrf.mxu3 }
 0x26d   :  { %v308_v26 = vadd.f32 %v307_v23, %v252_v7 }
 0x26f   :  { %v318_v33 = vmax.f32 %v308_v26, 0.0 }
 0x271   :  { %v374_v39 = vmul.f32 %v361_v36, %v318_v33 }
 0x273   :  { %v381_v44 = vadd.f32 %v380_v41, %v374_v39 }
 0x274   :  { %v309_v37 = vpop.f32.mrf.mxu3 }
 0x275   :  { %v310_v40 = vadd.f32 %v309_v37, %v257_v18 }
 0x277   :  { %v319_v42 = vmax.f32 %v310_v40, 0.0 }
 0x279   :  { %v375_v45 = vmul.f32 %v366_v43, %v319_v42 }
 0x27b   :  { %v382_v46 = vadd.f32 %v381_v44, %v375_v45 }
 0x27d   :  { %v383_v47 = vrot.slane %v382_v46, 4 }
 0x27f   :  { %v384_v48 = vadd.f32 %v383_v47, %v382_v46 }
 0x281   :  { %v385_v49 = vrot.slane %v384_v48, 2 }
 0x283   :  { %v386_v50 = vadd.f32 %v385_v49, %v384_v48 }
 0x285   :  { %v387_v51 = vrot.slane %v386_v50, 1 }
 0x287   :  { %v388_v53 = vadd.f32 %v387_v51, %v386_v50 }
 0x289   :  { %v391_v54 = vadd.f32 %v390_v52, %v388_v53 }
 0x28b   :  { %v460_v55 = vmul.f32 -1.442695, %v391_v54 }
 0x28d   :  { %483 = vpow2.f32 %v460_v55 }
 0x293   :  { %v484_v56 = vpop.eup %483 }
 0x294   :  { %v395_v57 = vadd.f32 1.0, %v484_v56 }
 0x296   :  { %485 = vrcp.f32 %v395_v57  ;;  %v407_v61 = vand.u32 2147483648, %v395_v57  ;;  %v405_v63 = vand.u32 2147483647, %v395_v57  ;;  %vm401_vm2 = vweird.f32 %v395_v57 }
 0x298   :  { %v408_v1 = vor.u32 1.1754944e-38, %v407_v61  ;;  %vm406_vm4 = vcmp.eq.f32.partialorder %v405_v63, 8.507059e+37 }
 0x29c   :  { %v486_v58 = vpop.eup %485 }
 0x29d   :  { %v397_v59 = vmul.f32 %v486_v58, %v395_v57  ;;  %vm402_vm1 = vweird.f32 %v486_v58 }
 0x29e   :  { %vm403_vm3 = vmor %vm401_vm2, %vm402_vm1 }
 0x29f   :  { %v398_v60 = vsub.f32 1.0, %v397_v59 }
 0x2a1   :  { %v399_v62 = vmul.f32 %v486_v58, %v398_v60 }
 0x2a3   :  { %v400_v0 = vadd.f32 %v486_v58, %v399_v62 }
 0x2a5   :  { %v404_v2 = vsel %vm403_vm3, %v486_v58, %v400_v0 }
 0x2a6   :  { %v409_v3 = vsel %vm406_vm4, %v408_v1, %v404_v2 }
 0x2a7   :  { %411 = vst [vmem:[#allocation3] sm:$0x1] %v409_v3 }
 0x2a8   :  { %422 = dma.vmem_to_hbm [thread:$0]  %s418_s26, 16, %s420_s6, [#allocation4]  }
 0x2a9   :  { %511 = dma.done.wait [#allocation4], 16  }
 0x2aa   :  { %512 = vsyncadd [#allocation4], 4294967280 }
 0x2ab   :  { %427 = vsyncpa [#allocation4], 1 }

</bundles_post_ra>
